<compile_context>
chip_gen: v6e
topology: v6e:2x2x1
jax: 0.10.0
libtpu: 0.0.40
codegen_flags: <defaults>
</compile_context>

<pallas_src>
import functools
import math

import jax
import jax.numpy as jnp
from jax import lax
from jax.experimental import pallas as pl
from jax.experimental.pallas import tpu as pltpu


def _round_up(n, k):
    return ((n + k - 1) // k) * k


def _cosface_kernel(x_ref, w_ref, tgt_ref, out_ref, wn_ref, *, s, m):
    # x_ref:   (TILE_B, D)       input dtype (f32 or bf16)
    # w_ref:   (TILE_C, D)       weight dtype (f32 or bf16)
    # tgt_ref: (TILE_B, 1)       int32
    # out_ref: (TILE_B, TILE_C)  f32
    # wn_ref:  (TILE_C, D)       MXU dtype scratch: s * L2-normalized weight tile (cached)
    f32 = jnp.float32
    eps2 = f32(1e-24)  # == (1e-12)^2; matches torch F.normalize clamp_min on the norm

    # Normalize (and pre-scale by s) this weight tile only on the first batch tile.
    @pl.when(pl.program_id(1) == 0)
    def _():
        w = w_ref[...].astype(f32)
        inv_wn = lax.rsqrt(jnp.maximum(jnp.sum(w * w, axis=-1, keepdims=True), eps2))
        wn_ref[...] = (w * (inv_wn * f32(s))).astype(wn_ref.dtype)

    # Normalize x in f32 (cheap: B*D work vs. B*C*D matmul).
    x = x_ref[...].astype(f32)
    inv_xn = lax.rsqrt(jnp.maximum(jnp.sum(x * x, axis=-1, keepdims=True), eps2))
    xn = (x * inv_xn).astype(wn_ref.dtype)

    # s * cosine, contracting the last dim of both operands (no transpose needed).
    acc = lax.dot_general(
        xn, wn_ref[...],
        dimension_numbers=(((1,), (1,)), ((), ())),
        preferred_element_type=jnp.float32,
    )

    # one_hot*(cos-m) + (1-one_hot)*cos == cos - m*one_hot
    # -> with s folded into wn: acc - s*m on the target column of this class tile.
    tile_c = out_ref.shape[1]
    col0 = pl.program_id(0) * tile_c
    cols = lax.broadcasted_iota(jnp.int32, out_ref.shape, 1) + col0
    out_ref[...] = jnp.where(cols == tgt_ref[...], acc - f32(s * m), acc).astype(
        out_ref.dtype
    )


def cosface_forward(x, weight, target, *, s, m, tile_b=128, tile_c=512):
    """CosFace logits: s * (cos(theta) - m * one_hot(target)).  Output is f32 (B, C)."""
    B, D = x.shape
    C, Dw = weight.shape
    assert D == Dw, "in_features mismatch"

    mxu_dtype = jnp.promote_types(x.dtype, weight.dtype)

    # Tile sizes: sublane/lane aligned, no larger than the (padded) problem.
    tile_b = _round_up(int(min(tile_b, _round_up(B, 8))), 8)
    tile_c = _round_up(int(min(tile_c, _round_up(C, 128))), 128)
    Bp = _round_up(B, tile_b)
    Cp = _round_up(C, tile_c)
    Dp = _round_up(D, 128)  # lane-align the contraction dim (zero pad: norms/dots unchanged)

    # Pad to tile multiples (zero rows normalize to zero -> sliced off afterwards).
    if Bp != B or Dp != D:
        x = jnp.pad(x, ((0, Bp - B), (0, Dp - D)))
    if Bp != B:
        target = jnp.pad(target, (0, Bp - B))
    if Cp != C or Dp != D:
        weight = jnp.pad(weight, ((0, Cp - C), (0, Dp - D)))
    tgt = target.astype(jnp.int32).reshape(Bp, 1)

    grid = (Cp // tile_c, Bp // tile_b)  # class tiles outer, batch tiles inner

    kernel = functools.partial(_cosface_kernel, s=float(s), m=float(m))

    # VMEM budget: double-buffered inputs/outputs + normalized-weight scratch.
    isz_x = jnp.dtype(x.dtype).itemsize
    isz_w = jnp.dtype(weight.dtype).itemsize
    isz_m = jnp.dtype(mxu_dtype).itemsize
    vmem_est = (
        2 * (tile_b * Dp * isz_x + tile_c * Dp * isz_w + tile_b * tile_c * 4 + tile_b * 4)
        + tile_c * Dp * isz_m
    )
    vmem_limit = min(max(2 * vmem_est + (4 << 20), 32 << 20), 48 << 20)

    cost = pl.CostEstimate(
        flops=2 * Bp * Cp * Dp + 3 * (Bp * (Cp // tile_c) + Cp) * Dp + 2 * Bp * Cp,
        transcendentals=Bp * (Cp // tile_c) + Cp,
        bytes_accessed=(
            Cp * Dp * isz_w                       # weight streamed once
            + (Cp // tile_c) * Bp * Dp * isz_x    # x streamed once per class tile
            + Bp * Cp * 4                         # output
            + (Cp // tile_c) * Bp * 4             # targets
        ),
    )

    out = pl.pallas_call(
        kernel,
        out_shape=jax.ShapeDtypeStruct((Bp, Cp), jnp.float32),
        grid_spec=pltpu.PrefetchScalarGridSpec(
            num_scalar_prefetch=0,
            grid=grid,
            in_specs=[
                pl.BlockSpec((tile_b, Dp), lambda c, b: (b, 0)),   # x
                pl.BlockSpec((tile_c, Dp), lambda c, b: (c, 0)),   # weight (resident per c)
                pl.BlockSpec((tile_b, 1), lambda c, b: (b, 0)),    # target
            ],
            out_specs=pl.BlockSpec((tile_b, tile_c), lambda c, b: (b, c)),
            scratch_shapes=[pltpu.VMEM((tile_c, Dp), mxu_dtype)],
        ),
        compiler_params=pltpu.CompilerParams(
            dimension_semantics=("parallel", "arbitrary"),
            vmem_limit_bytes=int(vmem_limit),
        ),
        cost_estimate=cost,
    )(x, weight, tgt)

    return out[:B, :C]


def xavier_uniform(key, shape, dtype=jnp.float32):
    # nn.init.xavier_uniform_ for a (fan_out, fan_in) weight
    fan_out, fan_in = shape
    limit = math.sqrt(6.0 / (fan_in + fan_out))
    return jax.random.uniform(key, shape, dtype, minval=-limit, maxval=limit)


if __name__ == "__main__":
    # Small shapes that still exercise tiling + padding: 3 batch tiles x 3 class tiles.
    B, IN_FEATS, CLASSNUM = 24, 128, 600
    SCALE, MARGIN = 30.0, 0.35

    key = jax.random.PRNGKey(0)
    kx, kw, kt = jax.random.split(key, 3)

    x = jax.random.normal(kx, (B, IN_FEATS), dtype=jnp.float32)
    weight = xavier_uniform(kw, (CLASSNUM, IN_FEATS))
    target = jax.random.randint(kt, (B,), 0, CLASSNUM, dtype=jnp.int32)

    # f32 path (matches torch FloatTensor semantics)
    out = cosface_forward(x, weight, target, s=SCALE, m=MARGIN, tile_b=8, tile_c=256)
    jax.block_until_ready(out)

    # Pure-JAX reference
    xn = x / jnp.maximum(jnp.linalg.norm(x, axis=1, keepdims=True), 1e-12)
    wn = weight / jnp.maximum(jnp.linalg.norm(weight, axis=1, keepdims=True), 1e-12)
    cos = xn @ wn.T
    one_hot = jax.nn.one_hot(target, CLASSNUM, dtype=jnp.float32)
    ref = SCALE * (one_hot * (cos - MARGIN) + (1.0 - one_hot) * cos)

    assert out.shape == ref.shape
    assert jnp.allclose(out, ref, atol=2e-3, rtol=1e-4), "f32 mismatch vs reference"

    # bf16 storage path (halves weight DMA traffic); looser tolerance vs f32 reference.
    out_bf16 = cosface_forward(
        x.astype(jnp.bfloat16), weight.astype(jnp.bfloat16), target,
        s=SCALE, m=MARGIN, tile_b=8, tile_c=256,
    )
    jax.block_until_ready(out_bf16)
    assert float(jnp.max(jnp.abs(out_bf16.astype(jnp.float32) - ref))) < 0.5, \
        "bf16 path deviates too much from reference"

    print("KERNEL_OK")
</pallas_src>

<mosaic_0001>
module attributes {stable_mosaic.version = 11 : i64} {
  func.func @_cosface_kernel(%arg0: i32, %arg1: i32, %arg2: memref<8x128xf32, #tpu.memory_space<vmem>>, %arg3: memref<256x128xf32, #tpu.memory_space<vmem>>, %arg4: memref<8x1xi32, #tpu.memory_space<vmem>>, %arg5: memref<8x256xf32, #tpu.memory_space<vmem>>, %arg6: memref<256x128xf32, #tpu.memory_space<vmem>>) attributes {dimension_semantics = [#tpu.dimension_semantics<parallel>, #tpu.dimension_semantics<arbitrary>], iteration_bounds = array<i64: 3, 3>, scalar_prefetch = 0 : i64, scratch_operands = 1 : i64, tpu.core_type = #tpu.core_type<tc>, window_params = [{transform_indices = @transform_0, window_bounds = array<i64: 8, 128>}, {transform_indices = @transform_1, window_bounds = array<i64: 256, 128>}, {transform_indices = @transform_2, window_bounds = array<i64: 8, 1>}, {transform_indices = @transform_3, window_bounds = array<i64: 8, 256>}]} {
    %c0_i32 = arith.constant 0 : i32
    %0 = arith.cmpi eq, %arg1, %c0_i32 : i32
    %1 = arith.extui %0 : i1 to i32
    %cst = arith.constant 1.000000e-24 : f32
    %c0_i32_0 = arith.constant 0 : i32
    %2 = arith.cmpi ne, %1, %c0_i32_0 : i32
    scf.if %2 {
      %c0_12 = arith.constant 0 : index
      %c0_13 = arith.constant 0 : index
      %25 = vector.load %arg3[%c0_12, %c0_13] : memref<256x128xf32, #tpu.memory_space<vmem>>, vector<256x128xf32>
      %26 = arith.mulf %25, %25 : vector<256x128xf32>
      %cst_14 = arith.constant dense<0.000000e+00> : vector<256xf32>
      %27 = vector.multi_reduction <add>, %26, %cst_14 [1] : vector<256x128xf32> to vector<256xf32>
      %28 = vector.shape_cast %27 : vector<256xf32> to vector<256x1xf32>
      %29 = vector.broadcast %cst : f32 to vector<256x1xf32>
      %30 = arith.maximumf %28, %29 : vector<256x1xf32>
      %31 = math.rsqrt %30 : vector<256x1xf32>
      %cst_15 = arith.constant 3.000000e+01 : f32
      %32 = vector.broadcast %cst_15 : f32 to vector<256x1xf32>
      %33 = arith.mulf %31, %32 : vector<256x1xf32>
      %34 = vector.broadcast %33 : vector<256x1xf32> to vector<256x128xf32>
      %35 = arith.mulf %25, %34 : vector<256x128xf32>
      %c0_16 = arith.constant 0 : index
      %c0_17 = arith.constant 0 : index
      %36 = vector.load %arg6[%c0_16, %c0_17] : memref<256x128xf32, #tpu.memory_space<vmem>>, vector<256x128xf32>
      tpu.vector_store %arg6[%c0_16, %c0_17], %35 {strides = array<i32>} : memref<256x128xf32, #tpu.memory_space<vmem>>, vector<256x128xf32>,
    } else {
    }
    %c0 = arith.constant 0 : index
    %c0_1 = arith.constant 0 : index
    %3 = vector.load %arg2[%c0, %c0_1] : memref<8x128xf32, #tpu.memory_space<vmem>>, vector<8x128xf32>
    %4 = arith.mulf %3, %3 : vector<8x128xf32>
    %cst_2 = arith.constant dense<0.000000e+00> : vector<8xf32>
    %5 = vector.multi_reduction <add>, %4, %cst_2 [1] : vector<8x128xf32> to vector<8xf32>
    %6 = vector.shape_cast %5 : vector<8xf32> to vector<8x1xf32>
    %cst_3 = arith.constant 1.000000e-24 : f32
    %7 = vector.broadcast %cst_3 : f32 to vector<8x1xf32>
    %8 = arith.maximumf %6, %7 : vector<8x1xf32>
    %9 = math.rsqrt %8 : vector<8x1xf32>
    %10 = vector.broadcast %9 : vector<8x1xf32> to vector<8x128xf32>
    %11 = arith.mulf %3, %10 : vector<8x128xf32>
    %c0_4 = arith.constant 0 : index
    %c0_5 = arith.constant 0 : index
    %12 = vector.load %arg6[%c0_4, %c0_5] : memref<256x128xf32, #tpu.memory_space<vmem>>, vector<256x128xf32>
    %cst_6 = arith.constant dense<0.000000e+00> : vector<8x256xf32>
    %13 = tpu.matmul %11, %12, %cst_6 {dimension_numbers = #tpu.dot_dimension_numbers<[1], [1], [0], [0], [0, 0, 1, 0], [], []>} : vector<8x128xf32>, vector<256x128xf32>, vector<8x256xf32> -> vector<8x256xf32>
    %c256_i32 = arith.constant 256 : i32
    %14 = arith.muli %arg0, %c256_i32 : i32
    %15 = tpu.iota {dimensions = array<i32: 1>} : vector<8x256xi32>
    %16 = vector.broadcast %14 : i32 to vector<8x256xi32>
    %17 = arith.addi %15, %16 : vector<8x256xi32>
    %c0_7 = arith.constant 0 : index
    %c0_8 = arith.constant 0 : index
    %18 = vector.load %arg4[%c0_7, %c0_8] : memref<8x1xi32, #tpu.memory_space<vmem>>, vector<8x1xi32>
    %19 = vector.broadcast %18 : vector<8x1xi32> to vector<8x256xi32>
    %20 = arith.cmpi eq, %17, %19 : vector<8x256xi32>
    %cst_9 = arith.constant 1.050000e+01 : f32
    %21 = vector.broadcast %cst_9 : f32 to vector<8x256xf32>
    %22 = arith.subf %13, %21 : vector<8x256xf32>
    %23 = arith.select %20, %22, %13 : vector<8x256xi1>, vector<8x256xf32>
    %c0_10 = arith.constant 0 : index
    %c0_11 = arith.constant 0 : index
    %24 = vector.load %arg5[%c0_10, %c0_11] : memref<8x256xf32, #tpu.memory_space<vmem>>, vector<8x256xf32>
    tpu.vector_store %arg5[%c0_10, %c0_11], %23 {strides = array<i32>} : memref<8x256xf32, #tpu.memory_space<vmem>>, vector<8x256xf32>,
    return
  }
  func.func @transform_0(%arg0: i32, %arg1: i32) -> (i32, i32) {
    %c0_i32 = arith.constant 0 : i32
    %c0_i32_0 = arith.constant 0 : i32
    return %arg1, %c0_i32 : i32, i32
  }
  func.func @transform_1(%arg0: i32, %arg1: i32) -> (i32, i32) {
    %c0_i32 = arith.constant 0 : i32
    %c0_i32_0 = arith.constant 0 : i32
    return %arg0, %c0_i32 : i32, i32
  }
  func.func @transform_2(%arg0: i32, %arg1: i32) -> (i32, i32) {
    %c0_i32 = arith.constant 0 : i32
    %c0_i32_0 = arith.constant 0 : i32
    return %arg1, %c0_i32 : i32, i32
  }
  func.func @transform_3(%arg0: i32, %arg1: i32) -> (i32, i32) {
    %c0_i32 = arith.constant 0 : i32
    return %arg1, %arg0 : i32, i32
  }
}

</mosaic_0001>

<bundles_post_ra>
// kernel: tpu_custom_call.1
= control target key start
LH: loop header
LB: loop body
LE: loop exit
PB: predicated region body
PF: predicated region fallthrough
CT: control target
= control target key end

     0   :  { %8 = vsyncpa [#allocation4], 0  ;;  %s1597_s0 = inlined_call_operand.vmem [shape: f32[24,128], index: 0, kind: input, shape index: {}]   ;;  %s1598_s1 = inlined_call_operand.hbm [shape: f32[768,128], index: 1, kind: input, shape index: {}]   ;;  %s1599_s2 = inlined_call_operand.vmem [shape: s32[24,1], index: 2, kind: input, shape index: {}]   ;;  %s1600_s3 = inlined_call_operand.hbm [shape: f32[24,768], index: 3, kind: output, shape index: {}]  }
   0x1   :  { %10 = vsyncpa [#allocation4 + $0x1], 0 }
   0x2   :  { %11 = vsyncpa [#allocation5], 0 }
   0x3   :  { %13 = vsyncpa [#allocation5 + $0x1], 0  ;;  %s1189_s12 = smov 0   ;;  %s1191_s13 = smov 0  }
   0x4   :  { %s1193_s14 = smov 0   ;;  %s1195_s15 = smov 0  }
   0x5   :  { %s1197_s16 = smov 0   ;;  %s1199_s17 = smov 0  }
   0x6   :  { %s1201_s18 = smov 0   ;;  %s1203_s19 = smov 0  }
   0x7   :  { %s1205_s20 = smov 0   ;;  %s1207_s21 = smov 0  }
   0x8   :  { %s1209_s22 = smov 0  }
   0x9 LB: > { %1604 = sst [smem:[#allocation9_spill]] %s1158_s21  ;;  %s785_s23 = sadd.s32 4294967295, %s1162_s22   ;;  %s1162_s22 = sphi %s1209_s22, %s19_s22   ;;  %s1158_s21 = sphi %s1207_s21, %s1614_s21   ;;  %s1154_s20 = sphi %s1205_s20, %s1622_s20   ;;  %s1150_s19 = sphi %s1203_s19, %s1612_s19   ;;  %s1146_s18 = sphi %s1201_s18, %s1621_s18   ;;  %s1142_s17 = sphi %s1199_s17, %s1620_s17   ;;  %s1138_s16 = sphi %s1197_s16, %s1619_s16   ;;  %s1134_s15 = sphi %s1195_s15, %s1618_s15   ;;  %s1130_s14 = sphi %s1193_s14, %s1617_s14   ;;  %s1126_s13 = sphi %s1191_s13, %s1616_s13   ;;  %s1122_s12 = sphi %s1189_s12, %s1615_s12  }
   0xa   : > { %s786_s24 = sadd.s32 4294967294, %s1162_s22   ;;  %s28_s25 = sadd.s32 1, %s1154_s20 }
   0xb   : > { %s31_s26 = sadd.s32 1, %s1158_s21  ;;  %p29_p0 = scmp.ge.s32.totalorder %s28_s25, 3 }
   0xc   : > { %s64_s27 = sadd.s32 1, %s1142_s17  ;;  %p71_p1 = scmp.ne.s32.totalorder %s1142_s17, %s1138_s16 }
   0xd   : > { %p72_p2 = scmp.eq.s32.totalorder %s1162_s22, 0  ;;  %s1624_s25 = smov (%p29_p0, %s28_s25), 0 }
   0xe   : > { %1605 = sst [smem:[#allocation10_spill]] %s1624_s25  ;;  %s1626_s26 = smov (!%p29_p0, %s31_s26), %s1158_s21 }
   0xf   : > { %p1253_p3 = por %p72_p2, %p71_p1  ;;  %p77_p4 = scmp.ne.s32.totalorder %s1138_s16, %s1134_s15 }
  0x10   : > { %p33_p5 = scmp.ge.s32.totalorder %s1626_s26, 3  ;;  %p78_p6 = scmp.eq.s32.totalorder %s785_s23, 0 }
  0x11   : > { %s113_s29 = ssub.s32 %s1154_s20, %s1624_s25  ;;  %s118_s30 = sadd.s32 1, %s1130_s14 }
  0x12   : > { %s1628_s26 = smov (%p33_p5, %s1626_s26), 0  ;;  %p1263_p7 = por %p78_p6, %p77_p4 }
  0x13   : > { %1607 = sst [smem:[#allocation11_spill]] %s1628_s26  ;;  %p128_p8 = scmp.ne.s32.totalorder %s1130_s14, %s1126_s13 }
  0x14   : > { %s61_s5 = ssub.s32 %s1158_s21, %s1628_s26  ;;  %p129_p9 = scmp.eq.s32.totalorder %s785_s23, 8 }
  0x15   : > { %p62_p10 = scmp.eq.s32.totalorder %s61_s5, 0  ;;  %s115_s6 = sor.u32 %s113_s29, %s61_s5 }
  0x16   : > { %p116_p11 = scmp.eq.s32.totalorder %s115_s6, 0  ;;  %p1271_p12 = por %p129_p9, %p128_p8 }
  0x17   : > { %s1276_s8 = scalar_select %p62_p10, %s1142_s17, %s64_s27  }
  0x18   : > { %s1279_s9 = scalar_select %p116_p11, %s1130_s14, %s118_s30  }
  0x19   : > { %p134_p13 = scmp.ne.s32.totalorder %s1126_s13, %s1122_s12  ;;  %p135_p0 = scmp.eq.s32.totalorder %s786_s24, 8 }
  0x1a   : > { %p854_p1 = scmp.lt.s32.totalorder %s1162_s22, 9  ;;  %s162_s11 = sand.u32 1, %s1142_s17  }
  0x1b   : > { %p1284_p2 = por %p135_p0, %p134_p13  ;;  %s789_s15 = sshll.u32 %s162_s11, 8 }
  0x1c   : > { %s806_s23 = sshll.u32 %s1158_s21, 12  ;;  %s166_s26 = scalar_lea.vmem [#allocation3], %s789_s15 }
  0x1d   : > { %s172_s6 = scalar_lea.hbm %s1598_s1, %s806_s23  ;;  %s173_s25 = sshll.u32 %s166_s26, 4  ;;  %s174_s25 = int_to_ptr.vmem [resolvable:$true] %s173_s25 }
  0x1e   : > { %p1295_p4 = pnand %p854_p1, %p1253_p3  ;;  %p792_p5 = scmp.ge.s32.totalorder %s1162_s22, 1 }
  0x1f   : > { %s163_s24 = scalar_lea.sflag [#allocation4], %s162_s11  ;;  %s1027_s30 = scalar_lea.vmem %s174_s25, 4096 }
  0x20   : > { %p1016_p6 = pneg %p1295_p4  ;;  %p1028_p8 = scmp.ne.s32.totalorder %s174_s25, %s1027_s30 }
  0x21   : > { %s1164_s21 = smov [#allocation3]  }
  0x22   : > { %p1030_p9 = pnand %p1028_p8, %p1016_p6  ;;  %s1032_s29 = sshll.u32 %s1164_s21, 4  ;;  %s1033_s29 = int_to_ptr.vmem [resolvable:$false] %s1032_s29 }
  0x23   : > { %s1034_s15 = scalar_lea.vmem %s1033_s29, 8192  ;;  %p1035_p11 = scmp.lt.s32.totalorder %s174_s25, %s1033_s29 }
  0x24   : > { %p1031_p10 = pneg %p1030_p9  ;;  %p1036_p13 = scmp.lt.s32.totalorder %s1034_s15, %s1027_s30 }
  0x26   : > { %p1037_p0 = por %p1036_p13, %p1035_p11 }
  0x28   : > { %p1038_p3 = pnand %p1037_p0, %p1031_p10 }
  0x2a   : > { %1041 = shalt.err (!%p1038_p3)
}
  0x2b   : > { %s1165_s26 = smov 128   ;;  %s1166_s28 = smov 8  }
  0x2c   : > { %849 = dma.hbm_to_vmem [thread:$0]  (!%p1295_p4), %s172_s6, 4096, %s174_s25, %s163_s24, %s1165_s26, %s1165_s26, %s1166_s28  }
  0x2d   : > { %p188_p1 = scmp.lt.s32.totalorder %s1162_s22, 10 }
  0x2f   : > { %p189_p6 = pnand %p792_p5, %p188_p1 }
  0x30   : > { %s194_s21 = sand.u32 (!%p189_p6), 1, %s1138_s16  }
  0x31   : > { %192 = sbr.rel (%p189_p6) target bundleno = 657 (0x291), region = 32  ;;  %s793_s11 = sshll.u32 (!%p189_p6), %s194_s21, 8 }
  0x32   : > { %s195_s23 = scalar_lea.sflag (!%p189_p6), [#allocation4], %s194_s21  ;;  %s1308_s5 = scalar_lea.vmem (!%p189_p6), [#allocation3], %s793_s11 }
  0x36   : > { %1113 = dma.done.wait (%p1263_p7), %s195_s23, 4096  }
  0x37   : > { %1115 = vsyncadd (%p1263_p7), %s195_s23, 4294963200  ;;  %s226_s25 = sand.u32 1, %s1126_s13   ;;  %p229_p4 = scmp.lt.s32.totalorder %s1146_s18, 2 }
  0x38   : > { %s794_s6 = sshll.u32 %s226_s25, 4  ;;  %p797_p7 = scmp.ne.s32.totalorder %s1146_s18, 0 }
  0x39   : > { %s230_s27 = scalar_select %p229_p4, %s1146_s18, 2 }
  0x3a   : > { %s1329_s21 = scalar_lea.vmem [#allocation6], %s794_s6  ;;  %242 = sbr.rel (%p797_p7) target bundleno = 286 (0x11e), region = 40 }
  0x3b   : > { %s795_s24 = sshll.u32 %s230_s27, 3 }
  0x3c   : > { %s1322_s15 = scalar_lea.vmem %s1597_s0, %s795_s24  ;;  %s1327_s4 = scalar_lea.vmem %s1599_s2, %s795_s24 }
  0x3f   : > { %v1333_v0 = vld [vmem:[%s1308_s5 + $0x10] sm:$0xff]  ;;  %v1336_v1 = vld [vmem:[%s1308_s5] sm:$0xff]  ;;  %v1339_v2 = vld [vmem:[%s1308_s5 + $0x18] sm:$0xff] }
  0x40   : > { %v277_v3 = vmul.f32 %v1333_v0, %v1333_v0  ;;  %v275_v4 = vmul.f32 %v1336_v1, %v1336_v1  ;;  %v1346_v5 = vld [vmem:[%s1308_s5 + $0x8] sm:$0xff]  ;;  %v278_v6 = vmul.f32 %v1339_v2, %v1339_v2  ;;  %v1356_v9 = vld [vmem:[%s1308_s5 + $0x20] sm:$0xff]  ;;  %v1363_v12 = vld [vmem:[%s1308_s5 + $0x38] sm:$0xff] }
  0x41   : > { %v276_v7 = vmul.f32 %v1346_v5, %v1346_v5  ;;  %v1353_v8 = vld [vmem:[%s1308_s5 + $0x28] sm:$0xff]  ;;  %v279_v11 = vmul.f32 %v1356_v9, %v1356_v9  ;;  %v1366_v13 = vld [vmem:[%s1308_s5 + $0x30] sm:$0xff]  ;;  %v282_v14 = vmul.f32 %v1363_v12, %v1363_v12  ;;  %v1376_v17 = vld [vmem:[%s1308_s5 + $0x40] sm:$0xff] }
  0x42   : > { %311 = vadd.xlane.f32.xlu1 %v277_v3  ;;  %307 = vadd.xlane.f32.xlu0 %v275_v4  ;;  %v280_v10 = vmul.f32 %v1353_v8, %v1353_v8  ;;  %v281_v15 = vmul.f32 %v1366_v13, %v1366_v13  ;;  %v1373_v16 = vld [vmem:[%s1308_s5 + $0x48] sm:$0xff]  ;;  %v283_v19 = vmul.f32 %v1376_v17, %v1376_v17  ;;  %v1383_v20 = vld [vmem:[%s1308_s5 + $0x58] sm:$0xff]  ;;  %v1386_v21 = vld [vmem:[%s1308_s5 + $0x50] sm:$0xff] }
  0x43   : > { %v284_v18 = vmul.f32 %v1373_v16, %v1373_v16  ;;  %v286_v22 = vmul.f32 %v1383_v20, %v1383_v20  ;;  %v285_v23 = vmul.f32 %v1386_v21, %v1386_v21  ;;  %v1393_v24 = vld [vmem:[%s1308_s5 + $0x68] sm:$0xff]  ;;  %v1396_v25 = vld [vmem:[%s1308_s5 + $0x60] sm:$0xff]  ;;  %v1403_v28 = vld [vmem:[%s1308_s5 + $0x78] sm:$0xff] }
  0x44   : > { %v288_v26 = vmul.f32 %v1393_v24, %v1393_v24  ;;  %v287_v27 = vmul.f32 %v1396_v25, %v1396_v25  ;;  %v1406_v29 = vld [vmem:[%s1308_s5 + $0x70] sm:$0xff]  ;;  %v290_v30 = vmul.f32 %v1403_v28, %v1403_v28  ;;  %v1413_v32 = vld [vmem:[%s1308_s5 + $0x88] sm:$0xff]  ;;  %v1416_v33 = vld [vmem:[%s1308_s5 + $0x80] sm:$0xff] }
  0x45   : > { %v289_v31 = vmul.f32 %v1406_v29, %v1406_v29  ;;  %v292_v34 = vmul.f32 %v1413_v32, %v1413_v32  ;;  %v291_v35 = vmul.f32 %v1416_v33, %v1416_v33  ;;  %v1423_v36 = vld [vmem:[%s1308_s5 + $0x98] sm:$0xff]  ;;  %v1426_v37 = vld [vmem:[%s1308_s5 + $0x90] sm:$0xff]  ;;  %v1433_v40 = vld [vmem:[%s1308_s5 + $0xa8] sm:$0xff] }
  0x46   : > { %313 = vadd.xlane.f32.xlu1 %v278_v6  ;;  %309 = vadd.xlane.f32.xlu0 %v276_v7  ;;  %v294_v38 = vmul.f32 %v1423_v36, %v1423_v36  ;;  %v293_v39 = vmul.f32 %v1426_v37, %v1426_v37  ;;  %v1436_v41 = vld [vmem:[%s1308_s5 + $0xa0] sm:$0xff]  ;;  %v296_v42 = vmul.f32 %v1433_v40, %v1433_v40  ;;  %v1443_v44 = vld [vmem:[%s1308_s5 + $0xb8] sm:$0xff]  ;;  %v1446_v45 = vld [vmem:[%s1308_s5 + $0xb0] sm:$0xff] }
  0x47   : > { %v295_v43 = vmul.f32 %v1436_v41, %v1436_v41  ;;  %v298_v46 = vmul.f32 %v1443_v44, %v1443_v44  ;;  %v297_v47 = vmul.f32 %v1446_v45, %v1446_v45  ;;  %v1453_v48 = vld [vmem:[%s1308_s5 + $0xc8] sm:$0xff]  ;;  %v1456_v49 = vld [vmem:[%s1308_s5 + $0xc0] sm:$0xff]  ;;  %v1463_v52 = vld [vmem:[%s1308_s5 + $0xd8] sm:$0xff] }
  0x48   : > { %v300_v50 = vmul.f32 %v1453_v48, %v1453_v48  ;;  %v299_v51 = vmul.f32 %v1456_v49, %v1456_v49  ;;  %v1466_v53 = vld [vmem:[%s1308_s5 + $0xd0] sm:$0xff]  ;;  %v302_v54 = vmul.f32 %v1463_v52, %v1463_v52  ;;  %v1473_v56 = vld [vmem:[%s1308_s5 + $0xe8] sm:$0xff]  ;;  %v1476_v57 = vld [vmem:[%s1308_s5 + $0xe0] sm:$0xff] }
  0x49   : > { %v301_v55 = vmul.f32 %v1466_v53, %v1466_v53  ;;  %v304_v58 = vmul.f32 %v1473_v56, %v1473_v56  ;;  %v303_v59 = vmul.f32 %v1476_v57, %v1476_v57  ;;  %v1483_v60 = vld [vmem:[%s1308_s5 + $0xf8] sm:$0xff]  ;;  %v1486_v61 = vld [vmem:[%s1308_s5 + $0xf0] sm:$0xff] }
  0x4a   : > { %317 = vadd.xlane.f32.xlu1 %v280_v10  ;;  %315 = vadd.xlane.f32.xlu0 %v279_v11  ;;  %v306_v62 = vmul.f32 %v1483_v60, %v1483_v60  ;;  %v305_v63 = vmul.f32 %v1486_v61, %v1486_v61 }
  0x4e   : > { %321 = vadd.xlane.f32.xlu1 %v282_v14  ;;  %319 = vadd.xlane.f32.xlu0 %v281_v15 }
  0x52   : > { %325 = vadd.xlane.f32.xlu1 %v284_v18  ;;  %323 = vadd.xlane.f32.xlu0 %v283_v19 }
  0x56   : > { %329 = vadd.xlane.f32.xlu1 %v286_v22  ;;  %327 = vadd.xlane.f32.xlu0 %v285_v23 }
  0x5a   : > { %333 = vadd.xlane.f32.xlu1 %v288_v26  ;;  %331 = vadd.xlane.f32.xlu0 %v287_v27 }
  0x5e   : > { %337 = vadd.xlane.f32.xlu1 %v290_v30  ;;  %335 = vadd.xlane.f32.xlu0 %v289_v31 }
  0x62   : > { %341 = vadd.xlane.f32.xlu1 %v292_v34  ;;  %339 = vadd.xlane.f32.xlu0 %v291_v35 }
  0x66   : > { %345 = vadd.xlane.f32.xlu1 %v294_v38  ;;  %343 = vadd.xlane.f32.xlu0 %v293_v39 }
  0x6a   : > { %349 = vadd.xlane.f32.xlu1 %v296_v42  ;;  %347 = vadd.xlane.f32.xlu0 %v295_v43 }
  0x6e   : > { %353 = vadd.xlane.f32.xlu1 %v298_v46  ;;  %351 = vadd.xlane.f32.xlu0 %v297_v47 }
  0x72   : > { %357 = vadd.xlane.f32.xlu1 %v300_v50  ;;  %355 = vadd.xlane.f32.xlu0 %v299_v51 }
  0x76   : > { %361 = vadd.xlane.f32.xlu1 %v302_v54  ;;  %359 = vadd.xlane.f32.xlu0 %v301_v55 }
  0x7a   : > { %365 = vadd.xlane.f32.xlu1 %v304_v58  ;;  %363 = vadd.xlane.f32.xlu0 %v303_v59 }
  0x7e   : > { %369 = vadd.xlane.f32.xlu1 %v306_v62  ;;  %367 = vadd.xlane.f32.xlu0 %v305_v63 }
  0xcb   : > { %v312_v3 = vpop.xlane.xlu1 %311  ;;  %v308_v4 = vpop.xlane.xlu0 %307 }
  0xcc   : > { %v373_v6 = vmax.f32 %v312_v3, 1e-24  ;;  %v371_v7 = vmax.f32 %v308_v4, 1e-24 }
  0xce   : > { %947 = vrsqrt.f32 %v373_v6 }
  0xcf   : > { %949 = vrsqrt.f32 %v371_v7  ;;  %v314_v10 = vpop.xlane.xlu1 %313  ;;  %v310_v11 = vpop.xlane.xlu0 %309 }
  0xd0   : > { %v374_v14 = vmax.f32 %v314_v10, 1e-24  ;;  %v372_v15 = vmax.f32 %v310_v11, 1e-24 }
  0xd2   : > { %951 = vrsqrt.f32 %v374_v14 }
  0xd3   : > { %953 = vrsqrt.f32 %v372_v15  ;;  %v318_v18 = vpop.xlane.xlu1 %317  ;;  %v316_v19 = vpop.xlane.xlu0 %315 }
  0xd4   : > { %v376_v22 = vmax.f32 %v318_v18, 1e-24  ;;  %v375_v23 = vmax.f32 %v316_v19, 1e-24 }
  0xd6   : > { %955 = vrsqrt.f32 %v376_v22 }
  0xd7   : > { %957 = vrsqrt.f32 %v375_v23  ;;  %v322_v26 = vpop.xlane.xlu1 %321  ;;  %v320_v27 = vpop.xlane.xlu0 %319 }
  0xd8   : > { %v378_v30 = vmax.f32 %v322_v26, 1e-24  ;;  %v377_v31 = vmax.f32 %v320_v27, 1e-24 }
  0xda   : > { %959 = vrsqrt.f32 %v378_v30 }
  0xdb   : > { %v948_v34 = vpop.eup %947  ;;  %961 = vrsqrt.f32 %v377_v31  ;;  %v326_v35 = vpop.xlane.xlu1 %325 }
  0xdc   : > { %v324_v38 = vpop.xlane.xlu0 %323  ;;  %v950_v39 = vpop.eup %949  ;;  %v437_v42 = vmul.f32 30.0, %v948_v34  ;;  %v380_v43 = vmax.f32 %v326_v35, 1e-24 }
  0xdd   : > { %v379_v46 = vmax.f32 %v324_v38, 1e-24  ;;  %v435_v47 = vmul.f32 30.0, %v950_v39 }
  0xde   : > { %v469_v50 = vmul.f32 %v437_v42, %v1333_v0  ;;  %963 = vrsqrt.f32 %v380_v43 }
  0xdf   : > { %v952_v51 = vpop.eup %951  ;;  %v467_v54 = vmul.f32 %v435_v47, %v1336_v1  ;;  %965 = vrsqrt.f32 %v379_v46  ;;  %v330_v55 = vpop.xlane.xlu1 %329 }
  0xe0   : > { %v328_v58 = vpop.xlane.xlu0 %327  ;;  %v954_v59 = vpop.eup %953  ;;  %501 = vst [vmem:[#allocation2 + $0xd8] sm:$0xff] %v469_v50  ;;  %v438_v62 = vmul.f32 30.0, %v952_v51  ;;  %v382_v63 = vmax.f32 %v330_v55, 1e-24 }
  0xe1   : > { %v381_v3 = vmax.f32 %v328_v58, 1e-24  ;;  %499 = vst [vmem:[#allocation2 + $0xb0] sm:$0xff] %v467_v54  ;;  %v436_v4 = vmul.f32 30.0, %v954_v59 }
  0xe2   : > { %v470_v6 = vmul.f32 %v438_v62, %v1339_v2  ;;  %967 = vrsqrt.f32 %v382_v63 }
  0xe3   : > { %v956_v7 = vpop.eup %955  ;;  %v468_v0 = vmul.f32 %v436_v4, %v1346_v5  ;;  %969 = vrsqrt.f32 %v381_v3  ;;  %v334_v10 = vpop.xlane.xlu1 %333 }
  0xe4   : > { %v332_v11 = vpop.xlane.xlu0 %331  ;;  %v958_v1 = vpop.eup %957  ;;  %502 = vst [vmem:[#allocation2 + $0x18] sm:$0xff] %v470_v6  ;;  %v440_v14 = vmul.f32 30.0, %v956_v7  ;;  %v384_v15 = vmax.f32 %v334_v10, 1e-24 }
  0xe5   : > { %v383_v18 = vmax.f32 %v332_v11, 1e-24  ;;  %500 = vst [vmem:[#allocation2] sm:$0xff] %v468_v0  ;;  %v439_v19 = vmul.f32 30.0, %v958_v1 }
  0xe6   : > { %v472_v22 = vmul.f32 %v440_v14, %v1353_v8  ;;  %971 = vrsqrt.f32 %v384_v15 }
  0xe7   : > { %v960_v23 = vpop.eup %959  ;;  %v471_v2 = vmul.f32 %v439_v19, %v1356_v9  ;;  %973 = vrsqrt.f32 %v383_v18  ;;  %v338_v26 = vpop.xlane.xlu1 %337 }
  0xe8   : > { %v336_v27 = vpop.xlane.xlu0 %335  ;;  %v962_v5 = vpop.eup %961  ;;  %504 = vst [vmem:[#allocation2 + $0x68] sm:$0xff] %v472_v22  ;;  %v442_v30 = vmul.f32 30.0, %v960_v23  ;;  %v386_v31 = vmax.f32 %v338_v26, 1e-24 }
  0xe9   : > { %v385_v34 = vmax.f32 %v336_v27, 1e-24  ;;  %503 = vst [vmem:[#allocation2 + $0x50] sm:$0xff] %v471_v2  ;;  %v441_v35 = vmul.f32 30.0, %v962_v5 }
  0xea   : > { %v474_v38 = vmul.f32 %v442_v30, %v1363_v12  ;;  %975 = vrsqrt.f32 %v386_v31 }
  0xeb   : > { %v964_v39 = vpop.eup %963  ;;  %v473_v8 = vmul.f32 %v441_v35, %v1366_v13  ;;  %977 = vrsqrt.f32 %v385_v34  ;;  %v342_v42 = vpop.xlane.xlu1 %341 }
  0xec   : > { %v340_v43 = vpop.xlane.xlu0 %339  ;;  %v966_v9 = vpop.eup %965  ;;  %506 = vst [vmem:[#allocation2 + $0x48] sm:$0xff] %v474_v38  ;;  %v444_v46 = vmul.f32 30.0, %v964_v39  ;;  %v388_v47 = vmax.f32 %v342_v42, 1e-24 }
  0xed   : > { %v387_v50 = vmax.f32 %v340_v43, 1e-24  ;;  %505 = vst [vmem:[#allocation2 + $0x30] sm:$0xff] %v473_v8  ;;  %v443_v51 = vmul.f32 30.0, %v966_v9 }
  0xee   : > { %v476_v54 = vmul.f32 %v444_v46, %v1373_v16  ;;  %979 = vrsqrt.f32 %v388_v47 }
  0xef   : > { %v968_v55 = vpop.eup %967  ;;  %v475_v12 = vmul.f32 %v443_v51, %v1376_v17  ;;  %981 = vrsqrt.f32 %v387_v50  ;;  %v346_v58 = vpop.xlane.xlu1 %345 }
  0xf0   : > { %v344_v59 = vpop.xlane.xlu0 %343  ;;  %v970_v13 = vpop.eup %969  ;;  %508 = vst [vmem:[#allocation2 + $0x88] sm:$0xff] %v476_v54  ;;  %v446_v62 = vmul.f32 30.0, %v968_v55  ;;  %v390_v63 = vmax.f32 %v346_v58, 1e-24 }
  0xf1   : > { %v389_v3 = vmax.f32 %v344_v59, 1e-24  ;;  %507 = vst [vmem:[#allocation2 + $0x80] sm:$0xff] %v475_v12  ;;  %v445_v4 = vmul.f32 30.0, %v970_v13 }
  0xf2   : > { %v478_v6 = vmul.f32 %v446_v62, %v1383_v20  ;;  %983 = vrsqrt.f32 %v390_v63 }
  0xf3   : > { %v972_v7 = vpop.eup %971  ;;  %v477_v16 = vmul.f32 %v445_v4, %v1386_v21  ;;  %985 = vrsqrt.f32 %v389_v3  ;;  %v350_v0 = vpop.xlane.xlu1 %349 }
  0xf4   : > { %v348_v10 = vpop.xlane.xlu0 %347  ;;  %v974_v17 = vpop.eup %973  ;;  %510 = vst [vmem:[#allocation2 + $0xb8] sm:$0xff] %v478_v6  ;;  %v448_v11 = vmul.f32 30.0, %v972_v7  ;;  %v392_v1 = vmax.f32 %v350_v0, 1e-24 }
  0xf5   : > { %v391_v14 = vmax.f32 %v348_v10, 1e-24  ;;  %509 = vst [vmem:[#allocation2 + $0xe8] sm:$0xff] %v477_v16  ;;  %v447_v15 = vmul.f32 30.0, %v974_v17 }
  0xf6   : > { %v480_v18 = vmul.f32 %v448_v11, %v1393_v24  ;;  %987 = vrsqrt.f32 %v392_v1 }
  0xf7   : > { %v976_v19 = vpop.eup %975  ;;  %v479_v20 = vmul.f32 %v447_v15, %v1396_v25  ;;  %989 = vrsqrt.f32 %v391_v14  ;;  %v354_v22 = vpop.xlane.xlu1 %353 }
  0xf8   : > { %v352_v23 = vpop.xlane.xlu0 %351  ;;  %v978_v21 = vpop.eup %977  ;;  %512 = vst [vmem:[#allocation2 + $0xf0] sm:$0xff] %v480_v18  ;;  %v450_v2 = vmul.f32 30.0, %v976_v19  ;;  %v394_v26 = vmax.f32 %v354_v22, 1e-24 }
  0xf9   : > { %v393_v27 = vmax.f32 %v352_v23, 1e-24  ;;  %511 = vst [vmem:[#allocation2 + $0x60] sm:$0xff] %v479_v20  ;;  %v449_v5 = vmul.f32 30.0, %v978_v21 }
  0xfa   : > { %v482_v30 = vmul.f32 %v450_v2, %v1403_v28  ;;  %991 = vrsqrt.f32 %v394_v26 }
  0xfb   : > { %v980_v31 = vpop.eup %979  ;;  %v481_v24 = vmul.f32 %v449_v5, %v1406_v29  ;;  %993 = vrsqrt.f32 %v393_v27  ;;  %v358_v34 = vpop.xlane.xlu1 %357 }
  0xfc   : > { %v356_v35 = vpop.xlane.xlu0 %355  ;;  %v982_v25 = vpop.eup %981  ;;  %514 = vst [vmem:[#allocation2 + $0x78] sm:$0xff] %v482_v30  ;;  %v452_v38 = vmul.f32 30.0, %v980_v31  ;;  %v396_v39 = vmax.f32 %v358_v34, 1e-24 }
  0xfd   : > { %v395_v8 = vmax.f32 %v356_v35, 1e-24  ;;  %513 = vst [vmem:[#allocation2 + $0x8] sm:$0xff] %v481_v24  ;;  %v451_v42 = vmul.f32 30.0, %v982_v25 }
  0xfe   : > { %v484_v43 = vmul.f32 %v452_v38, %v1413_v32  ;;  %995 = vrsqrt.f32 %v396_v39 }
  0xff   : > { %v984_v9 = vpop.eup %983  ;;  %v483_v28 = vmul.f32 %v451_v42, %v1416_v33  ;;  %997 = vrsqrt.f32 %v395_v8  ;;  %v362_v46 = vpop.xlane.xlu1 %361 }
 0x100   : > { %v360_v47 = vpop.xlane.xlu0 %359  ;;  %v986_v29 = vpop.eup %985  ;;  %516 = vst [vmem:[#allocation2 + $0x58] sm:$0xff] %v484_v43  ;;  %v454_v50 = vmul.f32 30.0, %v984_v9  ;;  %v398_v51 = vmax.f32 %v362_v46, 1e-24 }
 0x101   : > { %v397_v54 = vmax.f32 %v360_v47, 1e-24  ;;  %515 = vst [vmem:[#allocation2 + $0x38] sm:$0xff] %v483_v28  ;;  %v453_v55 = vmul.f32 30.0, %v986_v29 }
 0x102   : > { %v486_v12 = vmul.f32 %v454_v50, %v1423_v36  ;;  %999 = vrsqrt.f32 %v398_v51 }
 0x103   : > { %v988_v58 = vpop.eup %987  ;;  %v485_v32 = vmul.f32 %v453_v55, %v1426_v37  ;;  %1001 = vrsqrt.f32 %v397_v54  ;;  %v366_v59 = vpop.xlane.xlu1 %365 }
 0x104   : > { %v364_v13 = vpop.xlane.xlu0 %363  ;;  %v990_v33 = vpop.eup %989  ;;  %518 = vst [vmem:[#allocation2 + $0xc8] sm:$0xff] %v486_v12  ;;  %v456_v62 = vmul.f32 30.0, %v988_v58  ;;  %v400_v63 = vmax.f32 %v366_v59, 1e-24 }
 0x105   : > { %v399_v3 = vmax.f32 %v364_v13, 1e-24  ;;  %517 = vst [vmem:[#allocation2 + $0x40] sm:$0xff] %v485_v32  ;;  %v455_v4 = vmul.f32 30.0, %v990_v33 }
 0x106   : > { %v488_v6 = vmul.f32 %v456_v62, %v1433_v40  ;;  %1003 = vrsqrt.f32 %v400_v63 }
 0x107   : > { %v992_v7 = vpop.eup %991  ;;  %v487_v36 = vmul.f32 %v455_v4, %v1436_v41  ;;  %1005 = vrsqrt.f32 %v399_v3  ;;  %v370_v16 = vpop.xlane.xlu1 %369 }
 0x108   : > { %v368_v0 = vpop.xlane.xlu0 %367  ;;  %v994_v37 = vpop.eup %993  ;;  %520 = vst [vmem:[#allocation2 + $0x90] sm:$0xff] %v488_v6  ;;  %v458_v10 = vmul.f32 30.0, %v992_v7  ;;  %v402_v17 = vmax.f32 %v370_v16, 1e-24 }
 0x109   : > { %v401_v11 = vmax.f32 %v368_v0, 1e-24  ;;  %519 = vst [vmem:[#allocation2 + $0xe0] sm:$0xff] %v487_v36  ;;  %v457_v1 = vmul.f32 30.0, %v994_v37 }
 0x10a   : > { %v490_v14 = vmul.f32 %v458_v10, %v1443_v44  ;;  %1007 = vrsqrt.f32 %v402_v17 }
 0x10b   : > { %v996_v15 = vpop.eup %995  ;;  %v489_v40 = vmul.f32 %v457_v1, %v1446_v45  ;;  %1009 = vrsqrt.f32 %v401_v11 }
 0x10c   : > { %v998_v18 = vpop.eup %997  ;;  %522 = vst [vmem:[#allocation2 + $0xc0] sm:$0xff] %v490_v14  ;;  %v460_v41 = vmul.f32 30.0, %v996_v15 }
 0x10d   : > { %521 = vst [vmem:[#allocation2 + $0x70] sm:$0xff] %v489_v40  ;;  %v459_v19 = vmul.f32 30.0, %v998_v18 }
 0x10e   : > { %v492_v20 = vmul.f32 %v460_v41, %v1453_v48 }
 0x10f   : > { %v1000_v22 = vpop.eup %999  ;;  %v491_v23 = vmul.f32 %v459_v19, %v1456_v49 }
 0x110   : > { %v1002_v21 = vpop.eup %1001  ;;  %524 = vst [vmem:[#allocation2 + $0xd0] sm:$0xff] %v492_v20  ;;  %v462_v2 = vmul.f32 30.0, %v1000_v22 }
 0x111   : > { %523 = vst [vmem:[#allocation2 + $0xa8] sm:$0xff] %v491_v23  ;;  %v461_v44 = vmul.f32 30.0, %v1002_v21 }
 0x112   : > { %v494_v26 = vmul.f32 %v462_v2, %v1463_v52 }
 0x113   : > { %v1004_v27 = vpop.eup %1003  ;;  %v493_v45 = vmul.f32 %v461_v44, %v1466_v53 }
 0x114   : > { %v1006_v5 = vpop.eup %1005  ;;  %526 = vst [vmem:[#allocation2 + $0x28] sm:$0xff] %v494_v26  ;;  %v464_v30 = vmul.f32 30.0, %v1004_v27 }
 0x115   : > { %525 = vst [vmem:[#allocation2 + $0x10] sm:$0xff] %v493_v45  ;;  %v463_v31 = vmul.f32 30.0, %v1006_v5 }
 0x116   : > { %v496_v48 = vmul.f32 %v464_v30, %v1473_v56 }
 0x117   : > { %v1008_v24 = vpop.eup %1007  ;;  %v495_v49 = vmul.f32 %v463_v31, %v1476_v57 }
 0x118   : > { %v1010_v34 = vpop.eup %1009  ;;  %528 = vst [vmem:[#allocation2 + $0xf8] sm:$0xff] %v496_v48  ;;  %v466_v35 = vmul.f32 30.0, %v1008_v24 }
 0x119   : > { %527 = vst [vmem:[#allocation2 + $0xa0] sm:$0xff] %v495_v49  ;;  %v465_v25 = vmul.f32 30.0, %v1010_v34 }
 0x11a   : > { %v498_v52 = vmul.f32 %v466_v35, %v1483_v60 }
 0x11b   : > { %v497_v38 = vmul.f32 %v465_v25, %v1486_v61 }
 0x11c   : > { %530 = vst [vmem:[#allocation2 + $0x98] sm:$0xff] %v498_v52 }
 0x11d   : > { %529 = vst [vmem:[#allocation2 + $0x20] sm:$0xff] %v497_v38 }
 0x11e PF: > { %v1525_v53 = vld [vmem:[%s1322_s15] sm:$0xff]  ;;  %v553_v56 = vld [vmem:[#allocation2 + $0x78] sm:$0xff]  ;;  %v552_v42 = vld [vmem:[#allocation2 + $0x8] sm:$0xff]  ;;  %v1167_v13 = vmov 0   ;;  %v642_v40 = vlaneseq  ;;  %s798_s11 = sshll.u32 %s1150_s19, 8  ;;  %s841_s23 = smul.u32 6, %s1146_s18 }
 0x11f   : > { %v532_v57 = vmul.f32 %v1525_v53, %v1525_v53  ;;  %v567_v60 = vld [vmem:[#allocation2 + $0xf8] sm:$0xff]  ;;  %v551_v61 = vld [vmem:[#allocation2 + $0xf0] sm:$0xff]  ;;  %v550_v9 = vld [vmem:[#allocation2 + $0x60] sm:$0xff]  ;;  %1011 = vset.pattern.permute.xlu0 %v1167_v13  ;;  %v645_v41 = vstv %s798_s11  ;;  %s802_s5 = sshll.u32 %s1150_s19, 1  ;;  %s677_s24 = sshll.u32 %s1329_s21, 4  ;;  %s678_s24 = int_to_ptr.vmem [resolvable:$true] %s677_s24 }
 0x120   : > { %v566_v43 = vld [vmem:[#allocation2 + $0xa0] sm:$0xff]  ;;  %v565_v28 = vld [vmem:[#allocation2 + $0x28] sm:$0xff]  ;;  %v549_v46 = vld [vmem:[#allocation2 + $0xb8] sm:$0xff]  ;;  %v643_v18 = vand.u32 127, %v642_v40  ;;  %s673_s6 = sadd.s32 %s841_s23, %s802_s5  ;;  %s661_s29 = scalar_lea.sflag [#allocation5], %s226_s25 }
 0x121   : > { %533 = vadd.xlane.f32.xlu0 %v532_v57  ;;  %v564_v47 = vld [vmem:[#allocation2 + $0x10] sm:$0xff]  ;;  %v548_v29 = vld [vmem:[#allocation2 + $0xe8] sm:$0xff]  ;;  %v546_v55 = vld [vmem:[#allocation2 + $0x80] sm:$0xff]  ;;  %s803_s27 = sshll.u32 %s673_s6, 7  ;;  %s1042_s15 = scalar_lea.vmem %s678_s24, 256 }
 0x122   : > { %v563_v50 = vld [vmem:[#allocation2 + $0xd0] sm:$0xff]  ;;  %v547_v51 = vld [vmem:[#allocation2 + $0x88] sm:$0xff]  ;;  %v561_v12 = vld [vmem:[#allocation2 + $0xc0] sm:$0xff]  ;;  %v644_v19 = vadd.s32 128, %v643_v18  ;;  %v646_v20 = vadd.s32 %v645_v41, %v643_v18  ;;  %s1539_s19 = scalar_lea.hbm %s1600_s3, %s803_s27  ;;  %p1043_p5 = scmp.ne.s32.totalorder %s678_s24, %s1042_s15 }
 0x123   : > { %v569_v39 = vld [vmem:[#allocation2 + $0x98] sm:$0xff]  ;;  %v562_v54 = vld [vmem:[#allocation2 + $0xa8] sm:$0xff]  ;;  %v560_v32 = vld [vmem:[#allocation2 + $0x70] sm:$0xff]  ;;  %s1168_s26 = smov [#allocation6]  }
 0x124   : > { %807 = vmatprep.subr.mxu0 %v569_v39  ;;  %v568_v8 = vld [vmem:[#allocation2 + $0x20] sm:$0xff]  ;;  %v545_v58 = vld [vmem:[#allocation2 + $0x48] sm:$0xff]  ;;  %v544_v33 = vld [vmem:[#allocation2 + $0x30] sm:$0xff]  ;;  %v647_v23 = vadd.s32 %v645_v41, %v644_v19  ;;  %p1044_p8 = pnand %p1043_p5, %p1271_p12  ;;  %s1046_s28 = sshll.u32 %s1168_s26, 4  ;;  %s1047_s28 = int_to_ptr.vmem [resolvable:$false] %s1046_s28 }
 0x125   : > { %808 = vmatpush3.xpose.msra.mxu0 %v553_v56  ;;  %v648_v59 = vld [vmem:[%s1327_s4] sm:$0xff]  ;;  %v559_v62 = vld [vmem:[#allocation2 + $0x90] sm:$0xff]  ;;  %v543_v63 = vld [vmem:[#allocation2 + $0x68] sm:$0xff]  ;;  %s1048_s4 = scalar_lea.vmem %s1047_s28, 512  ;;  %p1049_p10 = scmp.lt.s32.totalorder %s678_s24, %s1047_s28 }
 0x126   : > { %809 = vmatprep.subr.mxu0 %v568_v8  ;;  %v558_v3 = vld [vmem:[#allocation2 + $0xe0] sm:$0xff]  ;;  %v542_v4 = vld [vmem:[#allocation2 + $0x50] sm:$0xff]  ;;  %v557_v6 = vld [vmem:[#allocation2 + $0xc8] sm:$0xff]  ;;  %p1045_p9 = pneg %p1044_p8  ;;  %p1050_p11 = scmp.lt.s32.totalorder %s1048_s4, %s1042_s15 }
 0x127   : > { %v541_v7 = vld [vmem:[#allocation2 + $0x18] sm:$0xff]  ;;  %v556_v36 = vld [vmem:[#allocation2 + $0x40] sm:$0xff]  ;;  %v538_v17 = vld [vmem:[#allocation2 + $0xb0] sm:$0xff] }
 0x128   : > { %v540_v16 = vld [vmem:[#allocation2 + $0xd8] sm:$0xff]  ;;  %v539_v37 = vld [vmem:[#allocation2] sm:$0xff]  ;;  %p1051_p13 = por %p1050_p11, %p1049_p10 }
 0x129   : > { %810 = vmatpush3.xpose.msra.mxu0 %v552_v42  ;;  %v555_v0 = vld [vmem:[#allocation2 + $0x58] sm:$0xff] }
 0x12a   : > { %811 = vmatprep.subr.mxu0 %v567_v60  ;;  %v554_v10 = vld [vmem:[#allocation2 + $0x38] sm:$0xff]  ;;  %p1052_p0 = pnand %p1051_p13, %p1045_p9 }
 0x12d   : > { %812 = vmatpush3.xpose.msra.mxu0 %v551_v61 }
 0x12e   : > { %813 = vmatprep.subr.mxu0 %v566_v43 }
 0x131   : > { %814 = vmatpush3.xpose.msra.mxu0 %v550_v9 }
 0x132   : > { %815 = vmatprep.subr.mxu0 %v565_v28 }
 0x135   : > { %816 = vmatpush3.xpose.msra.mxu0 %v549_v46 }
 0x136   : > { %817 = vmatprep.subr.mxu0 %v564_v47 }
 0x137   : > { %650 = vperm.xlu0 %1011, %v648_v59  }
 0x139   : > { %818 = vmatpush3.xpose.msra.mxu0 %v548_v29 }
 0x13a   : > { %819 = vmatprep.subr.mxu0 %v563_v50 }
 0x13d   : > { %820 = vmatpush3.xpose.msra.mxu0 %v547_v51 }
 0x13e   : > { %821 = vmatprep.subr.mxu0 %v562_v54 }
 0x141   : > { %822 = vmatpush3.xpose.msra.mxu0 %v546_v55 }
 0x142   : > { %823 = vmatprep.subr.mxu0 %v561_v12 }
 0x145   : > { %824 = vmatpush3.xpose.msra.mxu0 %v545_v58 }
 0x146   : > { %825 = vmatprep.subr.mxu0 %v560_v32 }
 0x149   : > { %826 = vmatpush3.xpose.msra.mxu0 %v544_v33 }
 0x14a   : > { %827 = vmatprep.subr.mxu0 %v559_v62 }
 0x14d   : > { %828 = vmatpush3.xpose.msra.mxu0 %v543_v63 }
 0x14e   : > { %829 = vmatprep.subr.mxu0 %v558_v3 }
 0x151   : > { %830 = vmatpush3.xpose.msra.mxu0 %v542_v4 }
 0x152   : > { %831 = vmatprep.subr.mxu0 %v557_v6 }
 0x155   : > { %832 = vmatpush3.xpose.msra.mxu0 %v541_v7 }
 0x156   : > { %833 = vmatprep.subr.mxu0 %v556_v36 }
 0x159   : > { %834 = vmatpush3.xpose.msra.mxu0 %v540_v16 }
 0x15a   : > { %835 = vmatprep.subr.mxu0 %v555_v0 }
 0x15d   : > { %836 = vmatpush3.xpose.msra.mxu0 %v539_v37 }
 0x15e   : > { %837 = vmatprep.subr.mxu0 %v554_v10 }
 0x161   : > { %838 = vmatpush3.xpose.msra.mxu0 %v538_v17 }
 0x1aa   : > { %v534_v11 = vpop.xlane.xlu0 %533 }
 0x1ab   : > { %v535_v1 = vmax.f32 %v534_v11, 1e-24 }
 0x1ad   : > { %1012 = vrsqrt.f32 %v535_v1 }
 0x1b2   : > { %v651_v22 = vpop.permute.xlu0 %650 }
 0x1b3   : > { %vm652_vm0 = vcmp.eq.s32.totalorder %v646_v20, %v651_v22  ;;  %vm653_vm1 = vcmp.eq.s32.totalorder %v647_v23, %v651_v22 }
 0x1ba   : > { %v1013_v14 = vpop.eup %1012 }
 0x1bb   : > { %v537_v15 = vmul.f32 %v1013_v14, %v1525_v53 }
 0x1bd   : > { %839 = vmatprep.mubr.f32.mxu0 %v537_v15 }
 0x1be   : > { %840 = vmatmul.mubr.f32.vlgmr.msra.gmra.mxu0 %v537_v15 }
 0x27e   : > { %v636_v21 = vpop.f32.mrf.mxu0 }
 0x27f   : > { %v799_v2 = vadd.f32 -10.5, %v636_v21 }
 0x280   : > { %v638_v44 = vpop.f32.mrf.mxu0 }
 0x281   : > { %v656_v26 = vsel %vm652_vm0, %v799_v2, %v636_v21  ;;  %v800_v27 = vadd.f32 -10.5, %v638_v44 }
 0x282   : > { %658 = vst [vmem:[%s1329_s21] sm:$0xff] %v656_v26 }
 0x283   : > { %v657_v45 = vsel %vm653_vm1, %v800_v27, %v638_v44 }
 0x284   : > { %659 = vst [vmem:[%s1329_s21 + $0x8] sm:$0xff] %v657_v45 }
 0x285   : > { %1055 = shalt.err (!%p1052_p0)
}
 0x286   : > { %s1056_s21 = scalar_lea.hbm %s1539_s19, 256  ;;  %s1060_s23 = scalar_lea.hbm %s1600_s3, 2304 }
 0x287   : > { %p1057_p3 = scmp.ne.s32.totalorder %s1539_s19, %s1056_s21  ;;  %p1061_p4 = scmp.lt.s32.totalorder %s1539_s19, %s1600_s3 }
 0x288   : > { %p1062_p7 = scmp.lt.s32.totalorder %s1060_s23, %s1056_s21 }
 0x289   : > { %p1058_p1 = pnand %p1057_p3, %p1271_p12 }
 0x28a   : > { %p1063_p5 = por %p1062_p7, %p1061_p4 }
 0x28b   : > { %p1059_p6 = pneg %p1058_p1 }
 0x28d   : > { %p1064_p8 = pnand %p1063_p5, %p1059_p6 }
 0x28f   : > { %1067 = shalt.err (!%p1064_p8)
}
 0x290   : > { %844 = dma.vmem_to_hbm [thread:$0]  (%p1271_p12), %s678_s24, 256, %s1539_s19, %s661_s29  }
 0x291 PF: > { %p855_p9 = scmp.ge.s32.totalorder %s1162_s22, 2  ;;  %s689_s27 = sand.u32 1, %s1122_s12  }
 0x292   : > { %s690_s30 = scalar_lea.sflag [#allocation5], %s689_s27 }
 0x293   : > { %p851_p10 = pnand %p855_p9, %p1284_p2 }
 0x295   : > { %p852_p11 = pneg %p851_p10 }
 0x297   : > { %1117 = dma.done.wait (%p852_p11), %s690_s30, 256  }
 0x298   : > { %1119 = vsyncadd (%p852_p11), %s690_s30, 4294967040  ;;  %s19_s22 = sadd.s32 1, %s1162_s22   ;;  %s1612_s19 = sld [smem:[#allocation9_spill]] }
 0x299   : > { %p16_p13 = scmp.ge.s32.totalorder %s19_s22, 11   ;;  %s1613_s7 = sld [smem:[#allocation10_spill]] }
 0x29a   : > { %s1614_s21 = sld [smem:[#allocation11_spill]]  ;;  %s1615_s12 = smov %s1126_s13 }
 0x29b   : > { %s1616_s13 = smov %s1130_s14  ;;  %s1617_s14 = smov %s1279_s9 }
 0x29c   : > { %s1618_s15 = smov %s1138_s16  ;;  %s1619_s16 = smov %s1142_s17 }
 0x29d   : > { %s1620_s17 = smov %s1276_s8  ;;  %s1621_s18 = smov %s1154_s20 }
 0x29e   :  { %18 = sbr.rel (!%p16_p13) target bundleno = 9 (0x9), region = 87 }
 0x29f   : > { %s1622_s20 = smov %s1613_s7 }
 0x2a3   :  { %695 = vsyncpa [#allocation4], 1 }
 0x2a4   :  { %697 = vsyncpa [#allocation4 + $0x1], 1 }
 0x2a5   :  { %698 = vsyncpa [#allocation5], 1 }
 0x2a6   :  { %700 = vsyncpa [#allocation5 + $0x1], 1 }

</bundles_post_ra>
